<compile_context>
chip_gen: v5e
topology: v5e:2x2
jax: 0.10.0
libtpu: 0.0.40
codegen_flags: <defaults>
</compile_context>

<pallas_src>
import jax
import jax.numpy as jnp
from jax.experimental import pallas as pl
from jax.experimental.pallas import tpu as pltpu


def _round_up(x, m):
    return ((x + m - 1) // m) * m


def _vmem_budget_bytes():
    """Per-core VMEM budget, leaving headroom for compiler scratch/semaphores."""
    try:
        cap = pltpu.get_tpu_info().vmem_capacity_bytes
    except Exception:
        cap = 64 * 2 ** 20  # conservative fallback (v7x has 64 MiB per TC)
    return int(cap * 0.8)   # ~51 MiB on v7x, ~102 MiB on v5e/v6e


# ----------------------------------------------------------------------------
# Kernels
# ----------------------------------------------------------------------------
def _ffn_resident_kernel(x_ref, w1_ref, b1_ref, w2_ref, b2_ref, o_ref):
    # Weights fully VMEM-resident (constant index maps): loaded from HBM once,
    # re-used across every row tile. No hidden-axis grid, no accumulator.
    h = jnp.dot(x_ref[...], w1_ref[...], preferred_element_type=jnp.float32)
    h = jnp.maximum(h + b1_ref[...], 0.0)
    # dropout == identity in eval mode
    out = jnp.dot(h.astype(w2_ref.dtype), w2_ref[...],
                  preferred_element_type=jnp.float32)
    o_ref[...] = (out + b2_ref[...]).astype(o_ref.dtype)


def _ffn_tiled_kernel(x_ref, w1_ref, b1_ref, w2_ref, b2_ref, o_ref, acc_ref):
    # Hidden dimension tiled along grid axis 1; (tm, E) f32 accumulator.
    k = pl.program_id(1)

    h = jnp.dot(x_ref[...], w1_ref[...], preferred_element_type=jnp.float32)
    h = jnp.maximum(h + b1_ref[...], 0.0)
    # dropout == identity in eval mode
    contrib = jnp.dot(h.astype(w2_ref.dtype), w2_ref[...],
                      preferred_element_type=jnp.float32)

    @pl.when(k == 0)
    def _():
        acc_ref[...] = contrib               # direct write: no zero-init RMW

    @pl.when(k != 0)
    def _():
        acc_ref[...] = acc_ref[...] + contrib

    @pl.when(k == pl.num_programs(1) - 1)
    def _():
        o_ref[...] = (acc_ref[...] + b2_ref[...]).astype(o_ref.dtype)


# ----------------------------------------------------------------------------
# One-time weight preprocessing (cache at model init)
# ----------------------------------------------------------------------------
def prepare_ffn_params(w1, b1, w2, b2, compute_dtype=jnp.bfloat16):
    """Transpose + lane-dense zero-pad + cast the Linear weights once.

    PyTorch nn.Linear conventions: w1 (hidden, emb_dim), w2 (emb_dim, hidden).
    Zero-padding is exact for Linear->ReLU->Linear; padded output columns are
    sliced away in feed_forward.
    """
    hidden, emb_dim = w1.shape
    e_pad = _round_up(emb_dim, 128)
    h_pad = _round_up(hidden, 128)

    w1t = w1.T.astype(compute_dtype)
    w2t = w2.T.astype(compute_dtype)
    if e_pad != emb_dim or h_pad != hidden:
        w1t = jnp.pad(w1t, ((0, e_pad - emb_dim), (0, h_pad - hidden)))
        w2t = jnp.pad(w2t, ((0, h_pad - hidden), (0, e_pad - emb_dim)))

    b1r = b1.astype(jnp.float32).reshape(1, hidden)
    b2r = b2.astype(jnp.float32).reshape(1, emb_dim)
    if h_pad != hidden:
        b1r = jnp.pad(b1r, ((0, 0), (0, h_pad - hidden)))
    if e_pad != emb_dim:
        b2r = jnp.pad(b2r, ((0, 0), (0, e_pad - emb_dim)))

    return dict(w1t=w1t, b1=b1r, w2t=w2t, b2=b2r,
                emb_dim=emb_dim, hidden=hidden, e_pad=e_pad, h_pad=h_pad,
                compute_dtype=compute_dtype)


# ----------------------------------------------------------------------------
# VMEM footprint models (conservative: double-buffer everything streamed)
# ----------------------------------------------------------------------------
def _resident_footprint(tm, e_pad, h_pad, csz, osz):
    return (2 * tm * e_pad * csz            # x tiles
            + 2 * 2 * e_pad * h_pad * csz   # W1t + W2t (conservative 2x)
            + 2 * (h_pad + e_pad) * 4       # biases
            + 2 * tm * e_pad * osz          # out tiles
            + tm * h_pad * 4                # f32 hidden intermediate
            + tm * e_pad * 4)               # f32 pre-cast output


def _tiled_footprint(tm, th, e_pad, h_pad, csz, osz):
    return (2 * tm * e_pad * csz            # x tiles
            + 2 * 2 * e_pad * th * csz      # W1t / W2t hidden slices
            + 2 * (th + e_pad) * 4          # bias slices
            + 2 * tm * e_pad * osz          # out tiles
            + tm * e_pad * 4                # f32 accumulator scratch
            + tm * th * 4)                  # f32 hidden slice


# ----------------------------------------------------------------------------
# Forward
# ----------------------------------------------------------------------------
def feed_forward(x, params, *, tm=512, th=None, force_tiled=False):
    """Fused Linear -> ReLU -> Dropout(eval: identity) -> Linear.

    `params` is the cached output of prepare_ffn_params.
    """
    emb_dim = params["emb_dim"]
    e_pad, h_pad = params["e_pad"], params["h_pad"]
    compute_dtype = params["compute_dtype"]
    out_dtype = x.dtype

    orig_shape = x.shape
    assert orig_shape[-1] == emb_dim, "last dim of x must be emb_dim"
    x2d = x.reshape(-1, emb_dim)
    n_rows = x2d.shape[0]

    csz = jnp.dtype(compute_dtype).itemsize
    osz = jnp.dtype(out_dtype).itemsize
    budget = _vmem_budget_bytes()

    # --- row tile selection -------------------------------------------------
    rows8 = _round_up(n_rows, 8)
    tm = min(tm, rows8)
    # bound last-tile padding waste to <= 25% of a tile
    while tm > 128 and (_round_up(n_rows, tm) - n_rows) * 4 > tm:
        tm //= 2
    tm = max(8, _round_up(tm, 8))
    # prefer >= 2 row tiles so both TensorCores (v7x) get work
    if tm >= rows8 and rows8 >= 256:
        tm = _round_up((rows8 + 1) // 2, 8)

    # --- path selection -----------------------------------------------------
    resident = (not force_tiled
                and _resident_footprint(tm, e_pad, h_pad, csz, osz) <= budget)

    if not resident:
        if th is not None:
            th = min(th, h_pad)
            assert th % 128 == 0 and h_pad % th == 0, "th must tile h_pad by 128s"
        else:
            for cand_tm in (tm, 256, 128):
                cand_tm = min(cand_tm, tm)
                found = None
                for cand_th in (1024, 512, 256, 128):
                    cand_th = min(cand_th, h_pad)
                    if h_pad % cand_th != 0:
                        continue
                    if _tiled_footprint(cand_tm, cand_th, e_pad, h_pad,
                                        csz, osz) <= budget:
                        found = cand_th
                        break
                if found is not None:
                    tm, th = cand_tm, found
                    break
            if th is None:  # last resort; may spill but stays correct
                tm, th = max(8, min(tm, 128)), 128

    rows_pad = _round_up(n_rows, tm)
    n_row_tiles = rows_pad // tm

    # --- pad/cast x only when needed ----------------------------------------
    xp = x2d if x2d.dtype == compute_dtype else x2d.astype(compute_dtype)
    if rows_pad != n_rows or e_pad != emb_dim:
        xp = jnp.pad(xp, ((0, rows_pad - n_rows), (0, e_pad - emb_dim)))

    # --- cost estimate -------------------------------------------------------
    weight_bytes = 2 * e_pad * h_pad * csz
    cost = pl.CostEstimate(
        flops=4 * rows_pad * e_pad * h_pad,
        transcendentals=0,
        bytes_accessed=(rows_pad * e_pad * (csz + osz)
                        + weight_bytes * (1 if resident else n_row_tiles)
                        + (h_pad + e_pad) * 4),
    )

    if resident:
        footprint = _resident_footprint(tm, e_pad, h_pad, csz, osz)
        vmem_limit = int(min(budget, max(32 * 2 ** 20, int(footprint * 1.25))))
        out = pl.pallas_call(
            _ffn_resident_kernel,
            out_shape=jax.ShapeDtypeStruct((rows_pad, e_pad), out_dtype),
            grid_spec=pltpu.PrefetchScalarGridSpec(
                num_scalar_prefetch=0,
                grid=(n_row_tiles,),
                in_specs=[
                    pl.BlockSpec((tm, e_pad),    lambda i: (i, 0)),  # x tile
                    pl.BlockSpec((e_pad, h_pad), lambda i: (0, 0)),  # W1^T resident
                    pl.BlockSpec((1, h_pad),     lambda i: (0, 0)),  # b1 resident
                    pl.BlockSpec((h_pad, e_pad), lambda i: (0, 0)),  # W2^T resident
                    pl.BlockSpec((1, e_pad),     lambda i: (0, 0)),  # b2 resident
                ],
                out_specs=pl.BlockSpec((tm, e_pad), lambda i: (i, 0)),
            ),
            compiler_params=pltpu.CompilerParams(
                dimension_semantics=("parallel",),
                vmem_limit_bytes=vmem_limit,
            ),
            cost_estimate=cost,
        )(xp, params["w1t"], params["b1"], params["w2t"], params["b2"])
    else:
        footprint = _tiled_footprint(tm, th, e_pad, h_pad, csz, osz)
        vmem_limit = int(min(budget, max(32 * 2 ** 20, int(footprint * 1.25))))
        out = pl.pallas_call(
            _ffn_tiled_kernel,
            out_shape=jax.ShapeDtypeStruct((rows_pad, e_pad), out_dtype),
            grid_spec=pltpu.PrefetchScalarGridSpec(
                num_scalar_prefetch=0,
                grid=(n_row_tiles, h_pad // th),
                in_specs=[
                    pl.BlockSpec((tm, e_pad), lambda i, k: (i, 0)),  # x tile
                    pl.BlockSpec((e_pad, th), lambda i, k: (0, k)),  # W1^T slice
                    pl.BlockSpec((1, th),     lambda i, k: (0, k)),  # b1 slice
                    pl.BlockSpec((th, e_pad), lambda i, k: (k, 0)),  # W2^T slice
                    pl.BlockSpec((1, e_pad),  lambda i, k: (0, 0)),  # b2
                ],
                out_specs=pl.BlockSpec((tm, e_pad), lambda i, k: (i, 0)),
                scratch_shapes=[pltpu.VMEM((tm, e_pad), jnp.float32)],
            ),
            compiler_params=pltpu.CompilerParams(
                dimension_semantics=("parallel", "arbitrary"),
                vmem_limit_bytes=vmem_limit,
            ),
            cost_estimate=cost,
        )(xp, params["w1t"], params["b1"], params["w2t"], params["b2"])

    if rows_pad != n_rows or e_pad != emb_dim:
        out = out[:n_rows, :emb_dim]
    return out.reshape(orig_shape)


# ----------------------------------------------------------------------------
# Reference + self-test
# ----------------------------------------------------------------------------
def _ref_feed_forward(x, w1, b1, w2, b2):
    h = jnp.maximum(x @ w1.T + b1, 0.0)
    return h @ w2.T + b2


if __name__ == "__main__":
    key = jax.random.PRNGKey(0)

    def make_case(k, batch, seq, emb_dim, hidden):
        kx, kw1, kb1, kw2, kb2 = jax.random.split(k, 5)
        x = jax.random.normal(kx, (batch, seq, emb_dim), dtype=jnp.float32)
        # PyTorch nn.Linear: weight = (out_features, in_features)
        w1 = jax.random.normal(kw1, (hidden, emb_dim), jnp.float32) * (1.0 / emb_dim ** 0.5)
        b1 = jax.random.normal(kb1, (hidden,), jnp.float32) * 0.01
        w2 = jax.random.normal(kw2, (emb_dim, hidden), jnp.float32) * (1.0 / hidden ** 0.5)
        b2 = jax.random.normal(kb2, (emb_dim,), jnp.float32) * 0.01
        return x, w1, b1, w2, b2

    k1, k2 = jax.random.split(key)

    # Case 1: tiny shapes (batch=2, seq=8, emb=32, hidden=64) -> resident path.
    x, w1, b1, w2, b2 = make_case(k1, 2, 8, 32, 64)
    params = prepare_ffn_params(w1, b1, w2, b2)   # one-time weight cache
    out = jax.block_until_ready(feed_forward(x, params))
    ref = _ref_feed_forward(x, w1, b1, w2, b2)
    assert out.shape == x.shape
    # bf16 MXU inputs with f32 accumulation -> loosened tolerance vs f32 ref.
    assert jnp.allclose(out, ref, atol=5e-2, rtol=5e-2), "resident path mismatch"

    # Case 2: ragged rows, forced hidden-tiled (accumulator) path with 2 k-steps.
    x, w1, b1, w2, b2 = make_case(k2, 2, 10, 64, 256)
    params = prepare_ffn_params(w1, b1, w2, b2)
    out = jax.block_until_ready(feed_forward(x, params, force_tiled=True, th=128))
    ref = _ref_feed_forward(x, w1, b1, w2, b2)
    assert out.shape == x.shape
    assert jnp.allclose(out, ref, atol=5e-2, rtol=5e-2), "tiled path mismatch"

    print("KERNEL_OK")
</pallas_src>

<mosaic_0001>
module attributes {stable_mosaic.version = 11 : i64} {
  func.func @_ffn_resident_kernel(%arg0: i32, %arg1: memref<16x128xbf16, #tpu.memory_space<vmem>>, %arg2: memref<128x128xbf16, #tpu.memory_space<vmem>>, %arg3: memref<1x128xf32, #tpu.memory_space<vmem>>, %arg4: memref<128x128xbf16, #tpu.memory_space<vmem>>, %arg5: memref<1x128xf32, #tpu.memory_space<vmem>>, %arg6: memref<16x128xf32, #tpu.memory_space<vmem>>) attributes {dimension_semantics = [#tpu.dimension_semantics<parallel>], iteration_bounds = array<i64: 1>, scalar_prefetch = 0 : i64, scratch_operands = 0 : i64, tpu.core_type = #tpu.core_type<tc>, window_params = [{transform_indices = @transform_0, window_bounds = array<i64: 16, 128>}, {pipeline_mode = #tpu.pipeline_mode<synchronous>, transform_indices = @transform_1, window_bounds = array<i64: 128, 128>}, {pipeline_mode = #tpu.pipeline_mode<synchronous>, transform_indices = @transform_2, window_bounds = array<i64: 1, 128>}, {pipeline_mode = #tpu.pipeline_mode<synchronous>, transform_indices = @transform_3, window_bounds = array<i64: 128, 128>}, {pipeline_mode = #tpu.pipeline_mode<synchronous>, transform_indices = @transform_4, window_bounds = array<i64: 1, 128>}, {transform_indices = @transform_5, window_bounds = array<i64: 16, 128>}]} {
    %c0 = arith.constant 0 : index
    %c0_0 = arith.constant 0 : index
    %0 = vector.load %arg1[%c0, %c0_0] : memref<16x128xbf16, #tpu.memory_space<vmem>>, vector<16x128xbf16>
    %c0_1 = arith.constant 0 : index
    %c0_2 = arith.constant 0 : index
    %1 = vector.load %arg2[%c0_1, %c0_2] : memref<128x128xbf16, #tpu.memory_space<vmem>>, vector<128x128xbf16>
    %cst = arith.constant dense<0.000000e+00> : vector<16x128xf32>
    %2 = tpu.matmul %0, %1, %cst {dimension_numbers = #tpu.dot_dimension_numbers<[1], [0], [0], [1], [0, 0, 1, 1], [], []>} : vector<16x128xbf16>, vector<128x128xbf16>, vector<16x128xf32> -> vector<16x128xf32>
    %c0_3 = arith.constant 0 : index
    %c0_4 = arith.constant 0 : index
    %3 = vector.load %arg3[%c0_3, %c0_4] : memref<1x128xf32, #tpu.memory_space<vmem>>, vector<1x128xf32>
    %4 = vector.broadcast %3 : vector<1x128xf32> to vector<16x128xf32>
    %5 = arith.addf %2, %4 : vector<16x128xf32>
    %cst_5 = arith.constant 0.000000e+00 : f32
    %6 = vector.broadcast %cst_5 : f32 to vector<16x128xf32>
    %7 = arith.maximumf %5, %6 : vector<16x128xf32>
    %8 = arith.truncf %7 : vector<16x128xf32> to vector<16x128xbf16>
    %c0_6 = arith.constant 0 : index
    %c0_7 = arith.constant 0 : index
    %9 = vector.load %arg4[%c0_6, %c0_7] : memref<128x128xbf16, #tpu.memory_space<vmem>>, vector<128x128xbf16>
    %cst_8 = arith.constant dense<0.000000e+00> : vector<16x128xf32>
    %10 = tpu.matmul %8, %9, %cst_8 {dimension_numbers = #tpu.dot_dimension_numbers<[1], [0], [0], [1], [0, 0, 1, 1], [], []>} : vector<16x128xbf16>, vector<128x128xbf16>, vector<16x128xf32> -> vector<16x128xf32>
    %c0_9 = arith.constant 0 : index
    %c0_10 = arith.constant 0 : index
    %11 = vector.load %arg5[%c0_9, %c0_10] : memref<1x128xf32, #tpu.memory_space<vmem>>, vector<1x128xf32>
    %12 = vector.broadcast %11 : vector<1x128xf32> to vector<16x128xf32>
    %13 = arith.addf %10, %12 : vector<16x128xf32>
    %c0_11 = arith.constant 0 : index
    %c0_12 = arith.constant 0 : index
    %14 = vector.load %arg6[%c0_11, %c0_12] : memref<16x128xf32, #tpu.memory_space<vmem>>, vector<16x128xf32>
    tpu.vector_store %arg6[%c0_11, %c0_12], %13 {strides = array<i32>} : memref<16x128xf32, #tpu.memory_space<vmem>>, vector<16x128xf32>,
    return
  }
  func.func @transform_0(%arg0: i32) -> (i32, i32) {
    %c0_i32 = arith.constant 0 : i32
    %c0_i32_0 = arith.constant 0 : i32
    return %arg0, %c0_i32 : i32, i32
  }
  func.func @transform_1(%arg0: i32) -> (i32, i32) {
    %c0_i32 = arith.constant 0 : i32
    %c0_i32_0 = arith.constant 0 : i32
    %c0_i32_1 = arith.constant 0 : i32
    return %c0_i32, %c0_i32_0 : i32, i32
  }
  func.func @transform_2(%arg0: i32) -> (i32, i32) {
    %c0_i32 = arith.constant 0 : i32
    %c0_i32_0 = arith.constant 0 : i32
    %c0_i32_1 = arith.constant 0 : i32
    return %c0_i32, %c0_i32_0 : i32, i32
  }
  func.func @transform_3(%arg0: i32) -> (i32, i32) {
    %c0_i32 = arith.constant 0 : i32
    %c0_i32_0 = arith.constant 0 : i32
    %c0_i32_1 = arith.constant 0 : i32
    return %c0_i32, %c0_i32_0 : i32, i32
  }
  func.func @transform_4(%arg0: i32) -> (i32, i32) {
    %c0_i32 = arith.constant 0 : i32
    %c0_i32_0 = arith.constant 0 : i32
    %c0_i32_1 = arith.constant 0 : i32
    return %c0_i32, %c0_i32_0 : i32, i32
  }
  func.func @transform_5(%arg0: i32) -> (i32, i32) {
    %c0_i32 = arith.constant 0 : i32
    %c0_i32_0 = arith.constant 0 : i32
    return %arg0, %c0_i32 : i32, i32
  }
}

</mosaic_0001>

<bundles_post_ra>
// kernel: tpu_custom_call.1
= control target key start
LH: loop header
LB: loop body
LE: loop exit
PB: predicated region body
PF: predicated region fallthrough
CT: control target
= control target key end

     0   :  { %10 = vsyncpa [#allocation3], 0  ;;  %s518_s0 = inlined_call_operand.hbm [shape: bf16[16,128], index: 0, kind: input, shape index: {}]   ;;  %s519_s1 = inlined_call_operand.hbm [shape: bf16[128,128], index: 1, kind: input, shape index: {}]   ;;  %s520_s2 = inlined_call_operand.vmem [shape: f32[1,128], index: 2, kind: input, shape index: {}]   ;;  %s521_s3 = inlined_call_operand.hbm [shape: bf16[128,128], index: 3, kind: input, shape index: {}]   ;;  %s522_s4 = inlined_call_operand.vmem [shape: f32[1,128], index: 4, kind: input, shape index: {}]   ;;  %s523_s5 = inlined_call_operand.hbm [shape: f32[16,128], index: 5, kind: output, shape index: {}]  }
   0x1   :  { %11 = vsyncpa [#allocation6], 0 }
   0x2   :  { %12 = vsyncpa [#allocation4], 0  ;;  %s30_s20 = sshll.u32 %s519_s1, 4  ;;  %s462_s21 = smov [#allocation5]   ;;  %s31_s20 = int_to_ptr.hbm [resolvable:$true] %s30_s20 }
   0x3   :  { %s32_s22 = sshll.u32 %s462_s21, 4  ;;  %s17_s25 = sshll.u32 %s518_s0, 4  ;;  %s33_s22 = int_to_ptr.vmem [resolvable:$true] %s32_s22  ;;  %s18_s25 = int_to_ptr.hbm [resolvable:$true] %s17_s25 }
   0x4   :  { %s463_s26 = smov 64   ;;  %s464_s27 = smov 4  }
   0x5   :  { %38 = dma.hbm_to_vmem [thread:$0]  %s31_s20, 1024, %s33_s22, [#allocation6], %s463_s26, %s463_s26, %s464_s27  }
   0x6   :  { %s465_s28 = smov [#allocation2]   ;;  %s45_s7 = sshll.u32 %s521_s3, 4  ;;  %s46_s7 = int_to_ptr.hbm [resolvable:$true] %s45_s7 }
   0x7   :  { %s19_s29 = sshll.u32 %s465_s28, 4  ;;  %s466_s1 = smov [#allocation7]   ;;  %s20_s29 = int_to_ptr.vmem [resolvable:$true] %s19_s29 }
   0x8   :  { %25 = dma.hbm_to_vmem [thread:$0]  %s18_s25, 128, %s20_s29, [#allocation3], %s463_s26, %s463_s26, %s464_s27  }
   0x9   :  { %s47_s8 = sshll.u32 %s466_s1, 4  ;;  %s48_s8 = int_to_ptr.vmem [resolvable:$true] %s47_s8 }
   0xa   :  { %53 = dma.hbm_to_vmem [thread:$0]  %s46_s7, 1024, %s48_s8, [#allocation6], %s463_s26, %s463_s26, %s464_s27  }
   0xb   :  { %456 = dma.done.wait [#allocation3], 128  }
   0xc   :  { %457 = vsyncadd [#allocation3], 4294967168 }
   0xd   :  { %458 = dma.done.wait [#allocation6], 2048  }
   0xe   :  { %459 = vsyncadd [#allocation6], 4294965248  ;;  %v341_v0 = vld [vmem:[#allocation5 + $0x38] sm:$0xff]  ;;  %v340_v1 = vld [vmem:[#allocation5 + $0x30] sm:$0xff]  ;;  %s467_s11 = smov [#allocation8]   ;;  %s468_s15 = smov 128  }
   0xf   :  { %144 = vmatpush.bf16.msra.mxu0 %v341_v0  ;;  %v349_v2 = vld [vmem:[#allocation7 + $0x38] sm:$0xff]  ;;  %v348_v3 = vld [vmem:[#allocation7 + $0x30] sm:$0xff]  ;;  %v339_v4 = vld [vmem:[#allocation5 + $0x28] sm:$0xff]  ;;  %s249_s12 = sshll.u32 %s467_s11, 4  ;;  %s469_s16 = smov 8   ;;  %s250_s12 = int_to_ptr.vmem [resolvable:$true] %s249_s12 }
  0x10   :  { %229 = vmatpush.bf16.msra.mxu1 %v349_v2  ;;  %v347_v5 = vld [vmem:[#allocation7 + $0x28] sm:$0xff]  ;;  %v338_v6 = vld [vmem:[#allocation5 + $0x20] sm:$0xff]  ;;  %v337_v8 = vld [vmem:[#allocation5 + $0x18] sm:$0xff] }
  0x11   :  { %v346_v7 = vld [vmem:[#allocation7 + $0x20] sm:$0xff]  ;;  %v336_v9 = vld [vmem:[#allocation5 + $0x10] sm:$0xff]  ;;  %v335_v10 = vld [vmem:[#allocation5 + $0x8] sm:$0xff] }
  0x12   :  { %v334_v11 = vld [vmem:[#allocation5] sm:$0xff]  ;;  %v333_v12 = vld [vmem:[#allocation2] sm:$0xff]  ;;  %v344_v14 = vld [vmem:[#allocation7 + $0x10] sm:$0xff] }
  0x13   :  { %145 = vmatpush.bf16.msra.mxu0 %v340_v1  ;;  %v345_v13 = vld [vmem:[#allocation7 + $0x18] sm:$0xff]  ;;  %v343_v15 = vld [vmem:[#allocation7 + $0x8] sm:$0xff]  ;;  %v342_v16 = vld [vmem:[#allocation7] sm:$0xff] }
  0x14   :  { %230 = vmatpush.bf16.msra.mxu1 %v348_v3  ;;  %v358_v18 = vld [vmem:[%s520_s2] ss:$0 sm:$0xff]  ;;  %s251_s2 = sshll.u32 %s523_s5, 4  ;;  %s252_s2 = int_to_ptr.hbm [resolvable:$true] %s251_s2 }
  0x15   :  { %v359_v25 = vld [vmem:[%s522_s4] ss:$0 sm:$0xff] }
  0x17   :  { %146 = vmatpush.bf16.msra.mxu0 %v339_v4 }
  0x18   :  { %231 = vmatpush.bf16.msra.mxu1 %v347_v5 }
  0x1b   :  { %147 = vmatpush.bf16.msra.mxu0 %v338_v6 }
  0x1c   :  { %232 = vmatpush.bf16.msra.mxu1 %v346_v7 }
  0x1f   :  { %148 = vmatpush.bf16.msra.mxu0 %v337_v8 }
  0x20   :  { %233 = vmatpush.bf16.msra.mxu1 %v345_v13 }
  0x23   :  { %149 = vmatpush.bf16.msra.mxu0 %v336_v9 }
  0x24   :  { %234 = vmatpush.bf16.msra.mxu1 %v344_v14 }
  0x27   :  { %150 = vmatpush.bf16.msra.mxu0 %v335_v10 }
  0x28   :  { %235 = vmatpush.bf16.msra.mxu1 %v343_v15 }
  0x2b   :  { %151 = vmatpush.bf16.msra.mxu0 %v334_v11 }
  0x2c   :  { %236 = vmatpush.bf16.msra.mxu1 %v342_v16 }
  0x2e   :  { %152 = vmatmul.bf16.vlgmr.msra.gmra.mxu0 %v333_v12 }
  0xab   :  { %v153_v17 = vpop.f32.mrf.mxu0 }
  0xac   :  { %v154_v19 = vadd.f32 %v358_v18, %v153_v17 }
  0xae   :  { %v158_v22 = vmax.f32 %v154_v19, 0.0 }
  0xb3   :  { %v155_v20 = vpop.f32.mrf.mxu0 }
  0xb4   :  { %v156_v21 = vadd.f32 %v358_v18, %v155_v20 }
  0xb6   :  { %v159_v23 = vmax.f32 %v156_v21, 0.0 }
  0xb8   :  { %v160_v24 = vpack.c.bf16 %v159_v23, %v158_v22 }
  0xba   :  { %237 = vmatmul.bf16.vlgmr.msra.gmra.mxu1 %v160_v24 }
 0x137   :  { %v238_v26 = vpop.f32.mrf.mxu1 }
 0x138   :  { %v239_v27 = vadd.f32 %v359_v25, %v238_v26 }
 0x13a   :  { %243 = vst [vmem:[#allocation8] sm:$0xff] %v239_v27 }
 0x13f   :  { %v240_v28 = vpop.f32.mrf.mxu1 }
 0x140   :  { %v241_v29 = vadd.f32 %v359_v25, %v240_v28 }
 0x142   :  { %244 = vst [vmem:[#allocation8 + $0x8] sm:$0xff] %v241_v29 }
 0x143   :  { %257 = dma.vmem_to_hbm [thread:$0]  %s250_s12, 256, %s252_s2, [#allocation4], %s468_s15, %s468_s15, %s469_s16  }
 0x144   :  { %460 = dma.done.wait [#allocation4], 256  }
 0x145   :  { %461 = vsyncadd [#allocation4], 4294967040 }
 0x146   :  { %262 = vsyncpa [#allocation3], 1 }
 0x147   :  { %263 = vsyncpa [#allocation6], 1 }
 0x148   :  { %264 = vsyncpa [#allocation4], 1 }

</bundles_post_ra>
